<compile_context>
chip_gen: v7x
topology: tpu7x:2x2x1
jax: 0.10.0
libtpu: 0.0.40
codegen_flags: <defaults>
</compile_context>

<pallas_src>
import jax
import jax.numpy as jnp
from jax.experimental import pallas as pl
from jax.experimental.pallas import tpu as pltpu


def _conv_bn_relu_kernel(x_ref, w_ref, b_ref, o_ref):
    # x_ref: (1, L, Cin_p)        compute dtype (bf16)
    # w_ref: (K, Cin_p, TN)       compute dtype (bf16), BN scale pre-folded
    # b_ref: (1, TN)              float32, folded BN shift
    # o_ref: (1, L_out, TN)       float32
    K = w_ref.shape[0]
    L_out = o_ref.shape[1]
    TN = o_ref.shape[2]

    x = x_ref[0]                                   # (L, Cin_p), single VMEM load
    acc = jnp.zeros((L_out, TN), jnp.float32)
    for k in range(K):                             # static unroll over conv taps
        acc = acc + jnp.dot(x[k:k + L_out, :], w_ref[k],
                            preferred_element_type=jnp.float32)
    # Epilogue only: folded BN bias + ReLU on the f32 accumulator.
    acc = acc + b_ref[...]                         # (1, TN) broadcasts over rows
    o_ref[0] = jnp.maximum(acc, 0.0).astype(o_ref.dtype)


def _round_up(x, m):
    return (x + m - 1) // m * m


def basic_conv1d(x, conv_weight, bn_gamma, bn_beta, bn_mean, bn_var,
                 *, eps=1e-3, compute_dtype=jnp.bfloat16, tile_n=None):
    """relu(batchnorm(conv1d(x)))  — eval-mode BN folded into the conv.

    x:           (B, C_in, L)      float32  (PyTorch layout)
    conv_weight: (C_out, C_in, K)  float32  (PyTorch Conv1d weight, bias=False)
    bn_*:        (C_out,)          float32  (gamma, beta, running_mean, running_var)
    returns:     (B, C_out, L_out) float32, L_out = L - K + 1  (stride=1, no padding)
    """
    B, C_in, L = x.shape
    C_out, C_in2, K = conv_weight.shape
    assert C_in == C_in2
    L_out = L - K + 1
    assert L_out >= 1

    # ---- Fold BatchNorm (running stats) into weight + bias ------------------
    scale = bn_gamma / jnp.sqrt(bn_var + eps)                 # (C_out,)
    w_folded = conv_weight * scale[:, None, None]             # (C_out, C_in, K)
    b_folded = bn_beta - bn_mean * scale                      # (C_out,)

    # ---- Lane-dense padding: channels up to multiples of 128 ----------------
    Cin_p = _round_up(C_in, 128)
    Cout_p = _round_up(C_out, 128)
    if tile_n is None:  # wide, unmasked output tiles; Cout_p is a multiple of 128
        tile_n = 512 if Cout_p % 512 == 0 else (256 if Cout_p % 256 == 0 else 128)
    assert Cout_p % tile_n == 0

    # x: (B, C_in, L) -> (B, L, Cin_p), channels on lanes, bf16 for the MXU.
    x_p = jnp.transpose(x, (0, 2, 1))
    x_p = jnp.pad(x_p, ((0, 0), (0, 0), (0, Cin_p - C_in))).astype(compute_dtype)

    # weight: (C_out, C_in, K) -> (K, Cin_p, Cout_p), output channels on lanes.
    w_p = jnp.transpose(w_folded, (2, 1, 0))
    w_p = jnp.pad(w_p, ((0, 0), (0, Cin_p - C_in), (0, Cout_p - C_out)))
    w_p = w_p.astype(compute_dtype)

    # bias stays f32 (added to the f32 accumulator in the epilogue).
    b_p = jnp.pad(b_folded, (0, Cout_p - C_out)).reshape(1, Cout_p).astype(jnp.float32)

    cost = pl.CostEstimate(
        flops=2 * B * L_out * C_out * C_in * K,
        transcendentals=0,
        bytes_accessed=4 * (B * C_in * L + C_out * C_in * K + B * C_out * L_out),
    )

    out_p = pl.pallas_call(
        _conv_bn_relu_kernel,
        out_shape=jax.ShapeDtypeStruct((B, L_out, Cout_p), jnp.float32),
        grid_spec=pltpu.PrefetchScalarGridSpec(
            num_scalar_prefetch=0,
            grid=(B, Cout_p // tile_n),
            in_specs=[
                pl.BlockSpec((1, L, Cin_p), lambda b, j: (b, 0, 0)),
                pl.BlockSpec((K, Cin_p, tile_n), lambda b, j: (0, 0, j)),
                pl.BlockSpec((1, tile_n), lambda b, j: (0, j)),
            ],
            out_specs=pl.BlockSpec((1, L_out, tile_n), lambda b, j: (b, 0, j)),
        ),
        compiler_params=pltpu.CompilerParams(
            dimension_semantics=("parallel", "parallel"),
        ),
        cost_estimate=cost,
    )(x_p, w_p, b_p)

    # Strip channel padding, return PyTorch layout (B, C_out, L_out).
    return jnp.transpose(out_p[:, :, :C_out], (0, 2, 1))


def reference(x, w, gamma, beta, mean, var, eps):
    """Pure-JAX f32 reference: Conv1d(bias=False) + BatchNorm1d(eval) + ReLU."""
    B, C_in, L = x.shape
    C_out, _, K = w.shape
    L_out = L - K + 1
    y = jnp.zeros((B, C_out, L_out), jnp.float32)
    for k in range(K):
        y = y + jnp.einsum('bcl,oc->bol', x[:, :, k:k + L_out], w[:, :, k])
    scale = gamma / jnp.sqrt(var + eps)
    y = y * scale[None, :, None] + (beta - mean * scale)[None, :, None]
    return jnp.maximum(y, 0.0)


if __name__ == "__main__":
    key = jax.random.PRNGKey(0)
    B, C_in, C_out, L, K = 2, 4, 8, 16, 3

    kx, kw, kg, kb, km, kv = jax.random.split(key, 6)
    x = jax.random.normal(kx, (B, C_in, L), dtype=jnp.float32)
    bound = 1.0 / (C_in * K) ** 0.5
    conv_w = jax.random.uniform(
        kw, (C_out, C_in, K), minval=-bound, maxval=bound, dtype=jnp.float32)
    gamma = jax.random.uniform(kg, (C_out,), minval=0.5, maxval=1.5, dtype=jnp.float32)
    beta = jax.random.uniform(kb, (C_out,), minval=-0.5, maxval=0.5, dtype=jnp.float32)
    running_mean = jax.random.uniform(
        km, (C_out,), minval=-0.5, maxval=0.5, dtype=jnp.float32)
    running_var = jax.random.uniform(
        kv, (C_out,), minval=0.5, maxval=1.5, dtype=jnp.float32)

    out = basic_conv1d(x, conv_w, gamma, beta, running_mean, running_var, eps=1e-3)
    out = jax.block_until_ready(out)

    ref = reference(x, conv_w, gamma, beta, running_mean, running_var, 1e-3)
    assert out.shape == (B, C_out, L - K + 1)
    max_err = float(jnp.max(jnp.abs(out - ref)))
    # bf16 matmul inputs (f32 accumulation) -> relaxed tolerance vs f32 reference.
    assert jnp.allclose(out, ref, atol=1e-1, rtol=1e-1), max_err
    print("KERNEL_OK")
</pallas_src>

<mosaic_0001>
module attributes {stable_mosaic.version = 11 : i64} {
  func.func @_conv_bn_relu_kernel(%arg0: i32, %arg1: i32, %arg2: memref<1x16x128xbf16, #tpu.memory_space<vmem>>, %arg3: memref<3x128x128xbf16, #tpu.memory_space<vmem>>, %arg4: memref<1x128xf32, #tpu.memory_space<vmem>>, %arg5: memref<1x14x128xf32, #tpu.memory_space<vmem>>) attributes {dimension_semantics = [#tpu.dimension_semantics<parallel>, #tpu.dimension_semantics<parallel>], iteration_bounds = array<i64: 2, 1>, scalar_prefetch = 0 : i64, scratch_operands = 0 : i64, tpu.core_type = #tpu.core_type<tc>, window_params = [{transform_indices = @transform_0, window_bounds = array<i64: 1, 16, 128>}, {transform_indices = @transform_1, window_bounds = array<i64: 3, 128, 128>}, {transform_indices = @transform_2, window_bounds = array<i64: 1, 128>}, {transform_indices = @transform_3, window_bounds = array<i64: 1, 14, 128>}]} {
    %c0 = arith.constant 0 : index
    %c0_0 = arith.constant 0 : index
    %c0_1 = arith.constant 0 : index
    %0 = vector.load %arg2[%c0, %c0_0, %c0_1] : memref<1x16x128xbf16, #tpu.memory_space<vmem>>, vector<1x16x128xbf16>
    %1 = vector.shape_cast %0 : vector<1x16x128xbf16> to vector<16x128xbf16>
    %cst = arith.constant 0.000000e+00 : f32
    %2 = vector.broadcast %cst : f32 to vector<14x128xf32>
    %3 = vector.extract_strided_slice %1 {offsets = [0, 0], sizes = [14, 128], strides = [1, 1]} : vector<16x128xbf16> to vector<14x128xbf16>
    %c0_2 = arith.constant 0 : index
    %c0_3 = arith.constant 0 : index
    %c0_4 = arith.constant 0 : index
    %4 = vector.load %arg3[%c0_2, %c0_3, %c0_4] : memref<3x128x128xbf16, #tpu.memory_space<vmem>>, vector<1x128x128xbf16>
    %5 = vector.shape_cast %4 : vector<1x128x128xbf16> to vector<128x128xbf16>
    %cst_5 = arith.constant dense<0.000000e+00> : vector<14x128xf32>
    %6 = tpu.matmul %3, %5, %cst_5 {dimension_numbers = #tpu.dot_dimension_numbers<[1], [0], [0], [1], [0, 0, 1, 1], [], []>} : vector<14x128xbf16>, vector<128x128xbf16>, vector<14x128xf32> -> vector<14x128xf32>
    %7 = arith.addf %2, %6 : vector<14x128xf32>
    %8 = vector.extract_strided_slice %1 {offsets = [1, 0], sizes = [14, 128], strides = [1, 1]} : vector<16x128xbf16> to vector<14x128xbf16>
    %c1 = arith.constant 1 : index
    %c0_6 = arith.constant 0 : index
    %c0_7 = arith.constant 0 : index
    %9 = vector.load %arg3[%c1, %c0_6, %c0_7] : memref<3x128x128xbf16, #tpu.memory_space<vmem>>, vector<1x128x128xbf16>
    %10 = vector.shape_cast %9 : vector<1x128x128xbf16> to vector<128x128xbf16>
    %cst_8 = arith.constant dense<0.000000e+00> : vector<14x128xf32>
    %11 = tpu.matmul %8, %10, %cst_8 {dimension_numbers = #tpu.dot_dimension_numbers<[1], [0], [0], [1], [0, 0, 1, 1], [], []>} : vector<14x128xbf16>, vector<128x128xbf16>, vector<14x128xf32> -> vector<14x128xf32>
    %12 = arith.addf %7, %11 : vector<14x128xf32>
    %13 = vector.extract_strided_slice %1 {offsets = [2, 0], sizes = [14, 128], strides = [1, 1]} : vector<16x128xbf16> to vector<14x128xbf16>
    %c2 = arith.constant 2 : index
    %c0_9 = arith.constant 0 : index
    %c0_10 = arith.constant 0 : index
    %14 = vector.load %arg3[%c2, %c0_9, %c0_10] : memref<3x128x128xbf16, #tpu.memory_space<vmem>>, vector<1x128x128xbf16>
    %15 = vector.shape_cast %14 : vector<1x128x128xbf16> to vector<128x128xbf16>
    %cst_11 = arith.constant dense<0.000000e+00> : vector<14x128xf32>
    %16 = tpu.matmul %13, %15, %cst_11 {dimension_numbers = #tpu.dot_dimension_numbers<[1], [0], [0], [1], [0, 0, 1, 1], [], []>} : vector<14x128xbf16>, vector<128x128xbf16>, vector<14x128xf32> -> vector<14x128xf32>
    %17 = arith.addf %12, %16 : vector<14x128xf32>
    %c0_12 = arith.constant 0 : index
    %c0_13 = arith.constant 0 : index
    %18 = vector.load %arg4[%c0_12, %c0_13] : memref<1x128xf32, #tpu.memory_space<vmem>>, vector<1x128xf32>
    %19 = vector.broadcast %18 : vector<1x128xf32> to vector<14x128xf32>
    %20 = arith.addf %17, %19 : vector<14x128xf32>
    %cst_14 = arith.constant 0.000000e+00 : f32
    %21 = vector.broadcast %cst_14 : f32 to vector<14x128xf32>
    %22 = arith.maximumf %20, %21 : vector<14x128xf32>
    %c0_15 = arith.constant 0 : index
    %c0_16 = arith.constant 0 : index
    %c0_17 = arith.constant 0 : index
    %23 = vector.load %arg5[%c0_15, %c0_16, %c0_17] : memref<1x14x128xf32, #tpu.memory_space<vmem>>, vector<1x14x128xf32>
    %24 = vector.shape_cast %23 : vector<1x14x128xf32> to vector<14x128xf32>
    %25 = vector.shape_cast %22 : vector<14x128xf32> to vector<1x14x128xf32>
    tpu.vector_store %arg5[%c0_15, %c0_16, %c0_17], %25 {strides = array<i32>} : memref<1x14x128xf32, #tpu.memory_space<vmem>>, vector<1x14x128xf32>,
    return
  }
  func.func @transform_0(%arg0: i32, %arg1: i32) -> (i32, i32, i32) {
    %c0_i32 = arith.constant 0 : i32
    %c0_i32_0 = arith.constant 0 : i32
    %c0_i32_1 = arith.constant 0 : i32
    return %arg0, %c0_i32, %c0_i32_0 : i32, i32, i32
  }
  func.func @transform_1(%arg0: i32, %arg1: i32) -> (i32, i32, i32) {
    %c0_i32 = arith.constant 0 : i32
    %c0_i32_0 = arith.constant 0 : i32
    %c0_i32_1 = arith.constant 0 : i32
    return %c0_i32, %c0_i32_0, %arg1 : i32, i32, i32
  }
  func.func @transform_2(%arg0: i32, %arg1: i32) -> (i32, i32) {
    %c0_i32 = arith.constant 0 : i32
    %c0_i32_0 = arith.constant 0 : i32
    return %c0_i32, %arg1 : i32, i32
  }
  func.func @transform_3(%arg0: i32, %arg1: i32) -> (i32, i32, i32) {
    %c0_i32 = arith.constant 0 : i32
    %c0_i32_0 = arith.constant 0 : i32
    return %arg0, %c0_i32, %arg1 : i32, i32, i32
  }
}

</mosaic_0001>

<bundles_post_ra>
// kernel: tpu_custom_call.1
= control target key start
LH: loop header
LB: loop body
LE: loop exit
PB: predicated region body
PF: predicated region fallthrough
CT: control target
= control target key end

     0   :  { %8 = vsyncpa [#allocation3], 0  ;;  %s1279_s0 = inlined_call_operand.hbm [shape: bf16[2,16,128], index: 0, kind: input, shape index: {}]   ;;  %s1280_s1 = inlined_call_operand.hbm [shape: bf16[3,128,128], index: 1, kind: input, shape index: {}]   ;;  %s1281_s2 = inlined_call_operand.vmem [shape: f32[1,128], index: 2, kind: input, shape index: {}]   ;;  %s1282_s3 = inlined_call_operand.vmem [shape: f32[2,14,128], index: 3, kind: output, shape index: {}]  }
   0x1   :  { %10 = vsyncpa [#allocation3 + $0x1], 0 }
   0x2   :  { %11 = vsyncpa [#allocation5], 0  ;;  %s1077_s12 = smov 0   ;;  %s1079_s13 = smov 0  }
   0x3   :  { %s1081_s14 = smov 0   ;;  %s1083_s15 = smov 0  }
   0x4   :  { %s1085_s16 = smov 0   ;;  %s1087_s17 = smov 0  }
   0x5 LB: > { %s711_s18 = sadd.s32 4294967295, %s1049_s17   ;;  %p49_p0 = scmp.ne.s32.totalorder %s1033_s13, %s1029_s12  ;;  %s1049_s17 = sphi %s1087_s17, %s17_s17   ;;  %s1045_s16 = sphi %s1085_s16, %s1299_s16   ;;  %s1041_s15 = sphi %s1083_s15, %s1298_s15   ;;  %s1037_s14 = sphi %s1081_s14, %s1297_s14   ;;  %s1033_s13 = sphi %s1079_s13, %s1296_s13   ;;  %s1029_s12 = sphi %s1077_s12, %s1295_s12  }
   0x6   : > { %p1107_p1 = scmp.eq.s32.totalorder %s711_s18, 0  ;;  %p713_p2 = scmp.ge.s32.totalorder %s1049_s17, 1 }
   0x7   : > { %p140_p3 = scmp.lt.s32.totalorder %s1049_s17, 3  ;;  %s1051_s22 = smov [#allocation4]  }
   0x8   : > { %s1287_s19 = scalar_select %p1107_p1, 1, 0 }
   0x9   : > { %p1115_p4 = por %p1107_p1, %p49_p0  ;;  %p1119_p5 = pnand %p713_p2, %p140_p3 }
   0xa   : > { %s154_s23 = sshll.u32 %s1051_s22, 4  ;;  %s29_s25 = sadd.s32 1, %s1045_s16  ;;  %s155_s23 = int_to_ptr.vmem [resolvable:$true] %s154_s23 }
   0xb   : > { %s1288_s20 = scalar_select %p1115_p4, 1, 0 }
   0xc   : > { %s1289_s21 = scalar_select %p1119_p5, 1, 0 }
   0xd   : > { %p848_p6 = pneg %p1119_p5  ;;  %s937_s28 = scalar_lea.hbm %s1280_s1, 3072 }
   0xe   : > { %p938_p8 = scmp.ne.s32.totalorder %s1280_s1, %s937_s28  ;;  %p944_p12 = scmp.lt.u32.totalorder %s937_s28, %s1280_s1 }
   0xf   : > { %p1127_p7 = pnand %p848_p6, %p1107_p1 }
  0x11   : > { %p939_p9 = pneg %p1127_p7 }
  0x13   : > { %p940_p10 = pnand %p939_p9, %p938_p8 }
  0x15   : > { %p941_p11 = pneg %p940_p10 }
  0x17   : > { %p946_p13 = pnand %p944_p12, %p941_p11 }
  0x19   : > { %949 = shalt.err (!%p946_p13)
}
  0x1a   : > { %s950_s6 = scalar_lea.vmem %s155_s23, 3072  ;;  %p958_p6 = scmp.lt.s32.totalorder %s155_s23, %s155_s23 }
  0x1b   : > { %p951_p0 = scmp.ne.s32.totalorder %s155_s23, %s950_s6  ;;  %p959_p1 = scmp.lt.s32.totalorder %s950_s6, %s950_s6 }
  0x1d   : > { %p953_p2 = pnand %p951_p0, %p939_p9  ;;  %p960_p4 = por %p959_p1, %p958_p6 }
  0x1f   : > { %p954_p3 = pneg %p953_p2 }
  0x21   : > { %p961_p5 = pnand %p960_p4, %p954_p3 }
  0x23   : > { %964 = shalt.err (!%p961_p5)
}
  0x24   : > { %s1052_s7 = smov 64   ;;  %s1053_s8 = smov 4  }
  0x25   : > { %851 = dma.hbm_to_vmem [thread:$0]  (!%p1127_p7), %s1280_s1, 3072, %s155_s23, [#allocation5], %s1052_s7, %s1052_s7, %s1053_s8  }
  0x26   : > { %p31_p1 = scmp.ge.s32.totalorder %s29_s25, 2  ;;  %s36_s11 = sadd.s32 1, %s1037_s14 }
  0x27   : > { %p43_p4 = scmp.ne.s32.totalorder %s1037_s14, %s1033_s13  ;;  %p44_p5 = scmp.eq.s32.totalorder %s1049_s17, 0 }
  0x28   : > { %s1301_s25 = smov (%p31_p1, %s29_s25), 0  ;;  %p857_p9 = scmp.lt.s32.totalorder %s1049_s17, 2 }
  0x29   : > { %p45_p8 = por %p44_p5, %p43_p4  ;;  %s33_s12 = ssub.s32 %s1045_s16, %s1301_s25 }
  0x2a   : > { %s174_s18 = sand.u32 1, %s1037_s14   ;;  %p34_p10 = scmp.eq.s32.totalorder %s33_s12, 0 }
  0x2b   : > { %s717_s22 = sshll.u32 %s174_s18, 3  ;;  %s753_s24 = sshll.u32 %s1045_s16, 7 }
  0x2c   : > { %s1163_s26 = scalar_select %p34_p10, %s1037_s14, %s36_s11  }
  0x2d   : > { %s1168_s23 = scalar_lea.hbm %s1279_s0, %s753_s24  ;;  %s178_s29 = scalar_lea.vmem [#allocation2], %s717_s22 }
  0x2e   : > { %s185_s30 = sshll.u32 %s178_s29, 4  ;;  %p1170_p7 = pnand %p857_p9, %p45_p8  ;;  %s1174_s30 = int_to_ptr.vmem [resolvable:$true] %s185_s30 }
  0x2f   : > { %s1176_s5 = scalar_lea.sflag [#allocation3], %s174_s18  ;;  %s965_s6 = scalar_lea.hbm %s1168_s23, 128 }
  0x30   : > { %p966_p11 = scmp.ne.s32.totalorder %s1168_s23, %s965_s6  ;;  %p967_p12 = pneg %p1170_p7 }
  0x31   : > { %s970_s11 = scalar_lea.hbm %s1279_s0, 256  ;;  %p971_p2 = scmp.lt.u32.totalorder %s1168_s23, %s1279_s0 }
  0x32   : > { %p968_p13 = pnand %p967_p12, %p966_p11  ;;  %p972_p3 = scmp.lt.u32.totalorder %s970_s11, %s965_s6 }
  0x33   : > { %p974_p1 = scmp.lt.u32.totalorder %s965_s6, %s1168_s23 }
  0x34   : > { %p969_p0 = pneg %p968_p13  ;;  %p973_p6 = por %p972_p3, %p971_p2 }
  0x36   : > { %p975_p4 = por %p974_p1, %p973_p6 }
  0x38   : > { %p976_p5 = pnand %p975_p4, %p969_p0 }
  0x3a   : > { %979 = shalt.err (!%p976_p5)
}
  0x3b   : > { %s980_s18 = scalar_lea.vmem %s1174_s30, 128  ;;  %s1054_s24 = smov [#allocation2]  }
  0x3c   : > { %p981_p8 = scmp.ne.s32.totalorder %s1174_s30, %s980_s18  ;;  %s985_s27 = sshll.u32 %s1054_s24, 4  ;;  %s986_s27 = int_to_ptr.vmem [resolvable:$false] %s985_s27 }
  0x3d   : > { %s987_s28 = scalar_lea.vmem %s986_s27, 256  ;;  %p988_p11 = scmp.lt.s32.totalorder %s1174_s30, %s986_s27 }
  0x3e   : > { %p983_p9 = pnand %p981_p8, %p967_p12  ;;  %p989_p13 = scmp.lt.s32.totalorder %s987_s28, %s980_s18 }
  0x40   : > { %p984_p10 = pneg %p983_p9  ;;  %p990_p2 = por %p989_p13, %p988_p11 }
  0x42   : > { %p991_p3 = pnand %p990_p2, %p984_p10 }
  0x44   : > { %994 = shalt.err (!%p991_p3)
}
  0x45   : > { %855 = dma.hbm_to_vmem [thread:$0]  (!%p1170_p7), %s1168_s23, 128, %s1174_s30, %s1176_s5, %s1052_s7, %s1052_s7, %s1053_s8  }
  0x46   : > { %p1292_p12 = scmp.ne.s32.totalorder %s1289_s21, 0 }
  0x47   : > { %s199_s29 = sand.u32 (!%p1292_p12), 1, %s1033_s13   ;;  %p1293_p0 = scmp.ne.s32.totalorder (!%p1292_p12), %s1288_s20, 0 }
  0x48   : > { %197 = sbr.rel (%p1292_p12) target bundleno = 370 (0x172), region = 32  ;;  %s1210_s6 = sshll.u32 (!%p1292_p12), %s199_s29, 3 }
  0x49   : > { %s200_s9 = scalar_lea.sflag (!%p1292_p12), [#allocation3], %s199_s29  ;;  %s203_s10 = scalar_lea.vmem (!%p1292_p12), [#allocation2], %s1210_s6 }
  0x4f   : > { %1020 = dma.done.wait (%p1293_p0), %s200_s9, 128  }
  0x50   : > { %1022 = vsyncadd (%p1293_p0), %s200_s9, 4294967168  ;;  %p1294_p6 = scmp.ne.s32.totalorder %s1287_s19, 0 }
  0x52   : > { %1024 = dma.done.wait (%p1294_p6), [#allocation5], 3072  }
  0x53   : > { %1026 = vsyncadd (%p1294_p6), [#allocation5], 4294964224  ;;  %v1055_v0 = vmov 0.0   ;;  %vm1056_vm0 = vmmov 0   ;;  %v912_v1 = vld [vmem:[#allocation4 + $0x40] sm:$0xff]   ;;  %v914_v3 = vld [vmem:[#allocation4 + $0x48] sm:$0xff]  }
  0x54   : > { %782 = vmatprep.subr.bf16.mxu0 %v1055_v0  ;;  %802 = vmatprep.subr.bf16.mxu1 %v1055_v0  ;;  %v913_v2 = vld [vmem:[#allocation4] sm:$0xff]   ;;  %v915_v4 = vld [vmem:[#allocation4 + $0x8] sm:$0xff]   ;;  %v916_v5 = vld [vmem:[#allocation4 + $0x50] sm:$0xff]   ;;  %p239_p7 = scmp.lt.s32.totalorder %s1041_s15, 1 }
  0x55   : > { %798 = vmatprep.mubr.msk.bf16.mxu0 %vm1056_vm0, %v1055_v0  ;;  %818 = vmatprep.mubr.msk.bf16.mxu1 %vm1056_vm0, %v1055_v0  ;;  %v917_v6 = vld [vmem:[#allocation4 + $0x10] sm:$0xff]   ;;  %v918_v7 = vld [vmem:[#allocation4 + $0x58] sm:$0xff]   ;;  %v920_v9 = vld [vmem:[#allocation4 + $0x60] sm:$0xff]  }
  0x56   : > { %783 = vmatpush3.bf16.msra.mxu0 %v912_v1  ;;  %803 = vmatpush3.bf16.msra.mxu1 %v913_v2  ;;  %v919_v8 = vld [vmem:[#allocation4 + $0x18] sm:$0xff]   ;;  %v921_v10 = vld [vmem:[#allocation4 + $0x20] sm:$0xff]   ;;  %v922_v12 = vld [vmem:[#allocation4 + $0x68] sm:$0xff]   ;;  %s1303_s15 = smov (!%p239_p7, %s1041_s15), 1 }
  0x57   : > { %784 = vmatprep.subr.bf16.mxu0 %v1055_v0  ;;  %804 = vmatprep.subr.bf16.mxu1 %v1055_v0  ;;  %v928_v11 = vld [vmem:[%s203_s10] sm:$0xff]   ;;  %v923_v13 = vld [vmem:[#allocation4 + $0x28] sm:$0xff]   ;;  %v929_v22 = vld [vmem:[#allocation4 + $0x80] sm:$0xff]   ;;  %s754_s21 = sshll.u32 %s1303_s15, 4 }
  0x58   : > { %v291_v14 = vshll.u32 %v928_v11, 16  ;;  %v924_v15 = vld [vmem:[#allocation4 + $0x70] sm:$0xff]   ;;  %v289_v17 = vshrl.u32 %v928_v11, 16  ;;  %v926_v19 = vld [vmem:[#allocation4 + $0x78] sm:$0xff]   ;;  %v930_v23 = vld [vmem:[#allocation4 + $0x88] sm:$0xff]   ;;  %v492_v30 = vrot.slane %v928_v11, 1  ;;  %s246_s23 = scalar_lea.vmem %s1282_s3, %s754_s21 }
  0x59   : > { %v925_v16 = vld [vmem:[#allocation4 + $0x30] sm:$0xff]   ;;  %v927_v20 = vld [vmem:[#allocation4 + $0x38] sm:$0xff]   ;;  %v933_v26 = vld [vmem:[#allocation4 + $0xa0] sm:$0xff]  }
  0x5a   : > { %785 = vmatpush3.bf16.msra.mxu0 %v914_v3  ;;  %805 = vmatpush3.bf16.msra.mxu1 %v915_v4  ;;  %v293_v18 = vrot.slane %v291_v14, 1  ;;  %v931_v24 = vld [vmem:[#allocation4 + $0x90] sm:$0xff]   ;;  %v932_v25 = vld [vmem:[#allocation4 + $0x98] sm:$0xff]   ;;  %v934_v27 = vld [vmem:[#allocation4 + $0xa8] sm:$0xff]  }
  0x5b   : > { %786 = vmatprep.subr.bf16.mxu0 %v1055_v0  ;;  %806 = vmatprep.subr.bf16.mxu1 %v1055_v0  ;;  %v935_v28 = vld [vmem:[#allocation4 + $0xb0] sm:$0xff]   ;;  %v936_v29 = vld [vmem:[#allocation4 + $0xb8] sm:$0xff]  }
  0x5c   : > { %v294_v21 = vor.u32 %v293_v18, %v289_v17  ;;  %v750_v42 = vld [vmem:[%s1281_s2] ss:$0 sm:$0xff] }
  0x5e   : > { %787 = vmatpush3.bf16.msra.mxu0 %v916_v5  ;;  %807 = vmatpush3.bf16.msra.mxu1 %v917_v6 }
  0x5f   : > { %788 = vmatprep.subr.bf16.mxu0 %v1055_v0  ;;  %808 = vmatprep.subr.bf16.mxu1 %v1055_v0 }
  0x62   : > { %789 = vmatpush3.bf16.msra.mxu0 %v918_v7  ;;  %809 = vmatpush3.bf16.msra.mxu1 %v919_v8 }
  0x63   : > { %790 = vmatprep.subr.bf16.mxu0 %v1055_v0  ;;  %810 = vmatprep.subr.bf16.mxu1 %v1055_v0 }
  0x66   : > { %791 = vmatpush3.bf16.msra.mxu0 %v920_v9  ;;  %811 = vmatpush3.bf16.msra.mxu1 %v921_v10 }
  0x67   : > { %792 = vmatprep.subr.bf16.mxu0 %v1055_v0  ;;  %812 = vmatprep.subr.bf16.mxu1 %v1055_v0 }
  0x6a   : > { %793 = vmatpush3.bf16.msra.mxu0 %v922_v12  ;;  %813 = vmatpush3.bf16.msra.mxu1 %v923_v13 }
  0x6b   : > { %794 = vmatprep.subr.bf16.mxu0 %v1055_v0  ;;  %814 = vmatprep.subr.bf16.mxu1 %v1055_v0 }
  0x6e   : > { %795 = vmatpush3.bf16.msra.mxu0 %v924_v15  ;;  %815 = vmatpush3.bf16.msra.mxu1 %v925_v16 }
  0x6f   : > { %796 = vmatprep.subr.bf16.mxu0 %v1055_v0  ;;  %816 = vmatprep.subr.bf16.mxu1 %v1055_v0 }
  0x72   : > { %797 = vmatpush3.bf16.msra.mxu0 %v926_v19  ;;  %817 = vmatpush3.bf16.msra.mxu1 %v927_v20 }
  0x73   : > { %822 = vmatprep.subr.bf16.mxu0 %v1055_v0 }
  0x75   : > { %799 = vmatmul.mubr.bf16.vlgmr.msra.gmra.mrb[0].mxu0 %v294_v21  ;;  %819 = vmatmul.mubr.bf16.vlgmr.msra.gmra.mrb[0].mxu1 %v928_v11 }
  0x76   : > { %823 = vmatpush3.bf16.msra.mxu0 %v929_v22  ;;  %838 = vmatprep.mubr.msk.bf16.mxu0 %vm1056_vm0, %v1055_v0 }
  0x77   : > { %824 = vmatprep.subr.bf16.mxu0 %v1055_v0 }
  0x7a   : > { %825 = vmatpush3.bf16.msra.mxu0 %v930_v23 }
  0x7b   : > { %826 = vmatprep.subr.bf16.mxu0 %v1055_v0 }
  0x7e   : > { %827 = vmatpush3.bf16.msra.mxu0 %v931_v24 }
  0x7f   : > { %828 = vmatprep.subr.bf16.mxu0 %v1055_v0 }
  0x82   : > { %829 = vmatpush3.bf16.msra.mxu0 %v932_v25 }
  0x83   : > { %830 = vmatprep.subr.bf16.mxu0 %v1055_v0 }
  0x86   : > { %831 = vmatpush3.bf16.msra.mxu0 %v933_v26 }
  0x87   : > { %832 = vmatprep.subr.bf16.mxu0 %v1055_v0 }
  0x8a   : > { %833 = vmatpush3.bf16.msra.mxu0 %v934_v27 }
  0x8b   : > { %834 = vmatprep.subr.bf16.mxu0 %v1055_v0 }
  0x8e   : > { %835 = vmatpush3.bf16.msra.mxu0 %v935_v28 }
  0x8f   : > { %836 = vmatprep.subr.bf16.mxu0 %v1055_v0 }
  0x92   : > { %837 = vmatpush3.bf16.msra.mxu0 %v936_v29 }
  0x95   : > { %839 = vmatmul.mubr.bf16.vlgmr.msra.gmra.mrb[4].mxu0 %v492_v30 }
 0x148   : > { %v378_v31 = vpop.f32.mrb[0].mxu0  ;;  %v468_v32 = vpop.f32.mrb[0].mxu1 }
 0x149   : > { %v800_v33 = vpop.f32.mrb[1].mxu0  ;;  %v469_v34 = vadd.f32 %v468_v32, %v378_v31  ;;  %v820_v35 = vpop.f32.mrb[1].mxu1 }
 0x14a   : > { %v381_v36 = vpop.f32.mrb[2].mxu0  ;;  %v471_v37 = vpop.f32.mrb[2].mxu1 }
 0x14b   : > { %v801_v38 = vpop.f32.mrb[3].mxu0  ;;  %v472_v39 = vadd.f32 %v471_v37, %v381_v36  ;;  %v821_v40 = vpop.f32.mrb[3].mxu1 }
 0x168   : > { %v576_v41 = vpop.f32.mrb[4].mxu0 }
 0x169   : > { %v583_v43 = vadd.f32 %v576_v41, %v469_v34  ;;  %v840_v44 = vpop.f32.mrb[5].mxu0 }
 0x16a   : > { %v579_v45 = vpop.f32.mrb[6].mxu0 }
 0x16b   : > { %v592_v46 = vadd.f32 %v750_v42, %v583_v43  ;;  %v584_v47 = vadd.f32 %v579_v45, %v472_v39  ;;  %v841_v48 = vpop.f32.mrb[7].mxu0 }
 0x16d   : > { %v594_v49 = vmax.f32 %v592_v46, 0.0  ;;  %v593_v50 = vadd.f32 %v750_v42, %v584_v47 }
 0x16f   : > { %596 = vst [vmem:[%s246_s23] sm:$0xff] %v594_v49  ;;  %v595_v51 = vmax.f32 %v593_v50, 0.0 }
 0x171   : > { %597 = vst [vmem:[%s246_s23 + $0x8] sm:$0x3f] %v595_v51 }
 0x172 PF: > { %s17_s17 = sadd.s32 1, %s1049_s17   ;;  %s1295_s12 = smov %s1033_s13 }
 0x173   : > { %p14_p1 = scmp.ge.s32.totalorder %s17_s17, 4   ;;  %s1296_s13 = smov %s1037_s14 }
 0x174   : > { %s1297_s14 = smov %s1163_s26  ;;  %s1298_s15 = smov %s1045_s16 }
 0x175   : > { %s1299_s16 = smov %s1301_s25  ;;  %16 = sbr.rel (!%p14_p1) target bundleno = 5 (0x5), region = 82 }
 0x17c   :  { %625 = vsyncpa [#allocation3], 1 }
 0x17d   :  { %627 = vsyncpa [#allocation3 + $0x1], 1 }
 0x17e   :  { %628 = vsyncpa [#allocation5], 1 }

</bundles_post_ra>
